<compile_context>
chip_gen: v5e
topology: v5e:2x2
jax: 0.10.0
libtpu: 0.0.40
codegen_flags: <defaults>
</compile_context>

<pallas_src>
import jax
import jax.numpy as jnp
from jax.experimental import pallas as pl
from jax.experimental.pallas import tpu as pltpu


_VMEM_BUDGET_BYTES = 20 * 1024 * 1024  # headroom under v7x's 32 MiB scoped default


def _round_up(x: int, m: int) -> int:
    return (x + m - 1) // m * m


def _cdiv(a: int, b: int) -> int:
    return (a + b - 1) // b


def _actor_kernel(x_ref, w1_ref, b1_ref, w2_ref, b2_ref, w3_ref, b3_ref, o_ref):
    x = x_ref[...]  # [TILE_B, S_pad] (f32 or bf16)

    # Layer 1: Linear + ReLU (MXU matmul, f32 accumulate; VPU math in f32).
    h1 = jnp.dot(x, w1_ref[...], preferred_element_type=jnp.float32) + b1_ref[...]
    h1 = jnp.maximum(h1, 0.0)

    # Layer 2: Linear + ReLU.
    h2 = jnp.dot(h1.astype(w2_ref.dtype), w2_ref[...],
                 preferred_element_type=jnp.float32) + b2_ref[...]
    h2 = jnp.maximum(h2, 0.0)

    # Layer 3: Linear + tanh (EUP).
    a = jnp.dot(h2.astype(w3_ref.dtype), w3_ref[...],
                preferred_element_type=jnp.float32) + b3_ref[...]
    o_ref[...] = jnp.tanh(a).astype(o_ref.dtype)


def prepare_actor_params(params, *, mxu_dtype=jnp.bfloat16):
    """One-time prep: zero-pad feature dims to 128 lanes and cast weights to
    the MXU operand dtype.  Call once at init and reuse for every forward.

    bf16 operands are recommended on v5e/v6e/v7x (halves the dominant weight
    DMA); biases stay f32 since all elementwise math runs in f32.
    """
    w1, b1 = params["w1"], params["b1"]
    w2, b2 = params["w2"], params["b2"]
    w3, b3 = params["w3"], params["b3"]

    state_dim, hidden_dim = w1.shape
    action_dim = w3.shape[1]
    S = _round_up(state_dim, 128)
    H = _round_up(hidden_dim, 128)
    A = _round_up(action_dim, 128)

    def pad2(x, rows, cols, dtype):
        x = jnp.asarray(x)
        return jnp.zeros((rows, cols), dtype).at[: x.shape[0], : x.shape[1]].set(
            x.astype(dtype))

    return {
        "w1": pad2(w1, S, H, mxu_dtype),
        "w2": pad2(w2, H, H, mxu_dtype),
        "w3": pad2(w3, H, A, mxu_dtype),
        "b1": pad2(jnp.reshape(b1, (1, -1)), 1, H, jnp.float32),
        "b2": pad2(jnp.reshape(b2, (1, -1)), 1, H, jnp.float32),
        "b3": pad2(jnp.reshape(b3, (1, -1)), 1, A, jnp.float32),
        "dims": (state_dim, hidden_dim, action_dim),  # real (unpadded) dims
    }


def _choose_batch_tiling(B, tile_b, num_cores, per_row_bytes, weight_bytes):
    """Pick (tile_b, padded_B, n_steps) minimizing pad waste, keeping the
    grid a multiple of the TensorCore count, under the VMEM budget."""
    # VMEM guard: double-buffered state + output tiles + resident weights.
    max_tb = max(8, (_VMEM_BUDGET_BYTES - weight_bytes) // max(per_row_bytes, 1))
    max_tb = max(8, max_tb // 8 * 8)
    tile_b = max(8, min(tile_b, max_tb))

    n_steps = max(1, _cdiv(B, tile_b))
    # Round step count up to a multiple of num_cores so ("parallel",) feeds
    # every TensorCore evenly (v7x has 2 TCs/chip; no-op when num_cores==1).
    if num_cores > 1 and B > 8 * num_cores and n_steps % num_cores:
        n_steps = _round_up(n_steps, num_cores)
    tb = _round_up(_cdiv(B, n_steps), 8)
    return tb, tb * n_steps, n_steps


def actor_forward(state, prepared, *, tile_b=1024, out_dtype=jnp.float32,
                  num_cores=None):
    """state: [B, state_dim] f32.  prepared: output of prepare_actor_params."""
    w1p, b1p = prepared["w1"], prepared["b1"]
    w2p, b2p = prepared["w2"], prepared["b2"]
    w3p, b3p = prepared["w3"], prepared["b3"]
    state_dim, hidden_dim, action_dim = prepared["dims"]

    B = state.shape[0]
    S, H = w1p.shape
    A = w3p.shape[1]
    mxu_dtype = w1p.dtype
    in_bytes = jnp.dtype(mxu_dtype).itemsize
    out_bytes = jnp.dtype(out_dtype).itemsize

    if num_cores is None:
        num_cores = getattr(jax.devices()[0], "num_cores", 1)
        if not isinstance(num_cores, int) or num_cores < 1:
            num_cores = 1

    weight_bytes = 2 * (S * H + H * H + H * A) * in_bytes + 2 * 4 * (2 * H + A)
    per_row_bytes = 2 * S * in_bytes + 2 * A * out_bytes
    tb, Bp, n_steps = _choose_batch_tiling(B, tile_b, num_cores,
                                           per_row_bytes, weight_bytes)

    # Pad the state once, directly in the MXU dtype (single materialization).
    if state.shape == (Bp, S) and state.dtype == mxu_dtype:
        xp = state
    else:
        xp = jnp.zeros((Bp, S), mxu_dtype).at[:B, :state_dim].set(
            state.astype(mxu_dtype))

    # Advisory cost estimate on the *real* (unpadded) problem size.
    cost = pl.CostEstimate(
        flops=2 * B * (state_dim * hidden_dim + hidden_dim * hidden_dim
                       + hidden_dim * action_dim),
        transcendentals=B * action_dim,
        bytes_accessed=(
            in_bytes * (B * state_dim + state_dim * hidden_dim
                        + hidden_dim * hidden_dim + hidden_dim * action_dim)
            + 4 * (2 * hidden_dim + action_dim)
            + out_bytes * B * action_dim),
    )

    out = pl.pallas_call(
        _actor_kernel,
        out_shape=jax.ShapeDtypeStruct((Bp, A), out_dtype),
        grid=(n_steps,),
        in_specs=[
            pl.BlockSpec((tb, S), lambda i: (i, 0)),   # state tile: pipelined
            pl.BlockSpec((S, H), lambda i: (0, 0)),    # weights/biases: resident
            pl.BlockSpec((1, H), lambda i: (0, 0)),
            pl.BlockSpec((H, H), lambda i: (0, 0)),
            pl.BlockSpec((1, H), lambda i: (0, 0)),
            pl.BlockSpec((H, A), lambda i: (0, 0)),
            pl.BlockSpec((1, A), lambda i: (0, 0)),
        ],
        out_specs=pl.BlockSpec((tb, A), lambda i: (i, 0)),  # lane-dense output
        compiler_params=pltpu.CompilerParams(
            dimension_semantics=("parallel",),  # batch axis shards across TCs
        ),
        cost_estimate=cost,
    )(xp, w1p, b1p, w2p, b2p, w3p, b3p)

    # Strip the batch / action padding outside the kernel.
    return out[:B, :action_dim]


def init_actor_params(key, state_dim, hidden_dim, action_dim):
    """PyTorch-style nn.Linear init (uniform +-1/sqrt(fan_in)); weights are [in, out]."""
    keys = jax.random.split(key, 6)

    def linear(kw, kb, fan_in, fan_out):
        bound = 1.0 / jnp.sqrt(fan_in)
        w = jax.random.uniform(kw, (fan_in, fan_out), jnp.float32, -bound, bound)
        b = jax.random.uniform(kb, (1, fan_out), jnp.float32, -bound, bound)
        return w, b

    w1, b1 = linear(keys[0], keys[1], state_dim, hidden_dim)
    w2, b2 = linear(keys[2], keys[3], hidden_dim, hidden_dim)
    w3, b3 = linear(keys[4], keys[5], hidden_dim, action_dim)
    return {"w1": w1, "b1": b1, "w2": w2, "b2": b2, "w3": w3, "b3": b3}


def actor_reference(state, params):
    h1 = jnp.maximum(state @ params["w1"] + params["b1"], 0.0)
    h2 = jnp.maximum(h1 @ params["w2"] + params["b2"], 0.0)
    return jnp.tanh(h2 @ params["w3"] + params["b3"])


if __name__ == "__main__":
    key = jax.random.PRNGKey(0)
    k_param, k_state, k_big = jax.random.split(key, 3)

    batch = 8
    state_dim = 16
    hidden_dim = 32
    action_dim = 4

    raw_params = init_actor_params(k_param, state_dim, hidden_dim, action_dim)
    state = jax.random.normal(k_state, (batch, state_dim), jnp.float32)
    ref = actor_reference(state, raw_params)

    # Exact path: f32 MXU operands.
    prep_f32 = prepare_actor_params(raw_params, mxu_dtype=jnp.float32)
    out = jax.block_until_ready(actor_forward(state, prep_f32))
    assert out.shape == (batch, action_dim)
    assert jnp.allclose(out, ref, atol=1e-5, rtol=1e-5), "f32 mismatch vs reference"

    # Default path: bf16 MXU operands (f32 accumulate / bias / ReLU / tanh).
    prep_bf16 = prepare_actor_params(raw_params)
    out_bf16 = jax.block_until_ready(actor_forward(state, prep_bf16))
    assert jnp.allclose(out_bf16, ref, atol=3e-2, rtol=3e-2), "bf16 mismatch"

    # Larger batch reuses the same prepared params (no per-call weight padding)
    # and exercises the balanced multi-step batch grid.
    big_state = jax.random.normal(k_big, (1000, state_dim), jnp.float32)
    big_ref = actor_reference(big_state, raw_params)
    big_out = jax.block_until_ready(actor_forward(big_state, prep_bf16, tile_b=256))
    assert big_out.shape == (1000, action_dim)
    assert jnp.allclose(big_out, big_ref, atol=3e-2, rtol=3e-2), "big-batch mismatch"

    print("KERNEL_OK")
</pallas_src>

<mosaic_0001>
module attributes {stable_mosaic.version = 11 : i64} {
  func.func @_actor_kernel(%arg0: i32, %arg1: memref<8x128xf32, #tpu.memory_space<vmem>>, %arg2: memref<128x128xf32, #tpu.memory_space<vmem>>, %arg3: memref<1x128xf32, #tpu.memory_space<vmem>>, %arg4: memref<128x128xf32, #tpu.memory_space<vmem>>, %arg5: memref<1x128xf32, #tpu.memory_space<vmem>>, %arg6: memref<128x128xf32, #tpu.memory_space<vmem>>, %arg7: memref<1x128xf32, #tpu.memory_space<vmem>>, %arg8: memref<8x128xf32, #tpu.memory_space<vmem>>) attributes {dimension_semantics = [#tpu.dimension_semantics<parallel>], iteration_bounds = array<i64: 1>, scalar_prefetch = 0 : i64, scratch_operands = 0 : i64, tpu.core_type = #tpu.core_type<tc>, window_params = [{transform_indices = @transform_0, window_bounds = array<i64: 8, 128>}, {pipeline_mode = #tpu.pipeline_mode<synchronous>, transform_indices = @transform_1, window_bounds = array<i64: 128, 128>}, {pipeline_mode = #tpu.pipeline_mode<synchronous>, transform_indices = @transform_2, window_bounds = array<i64: 1, 128>}, {pipeline_mode = #tpu.pipeline_mode<synchronous>, transform_indices = @transform_3, window_bounds = array<i64: 128, 128>}, {pipeline_mode = #tpu.pipeline_mode<synchronous>, transform_indices = @transform_4, window_bounds = array<i64: 1, 128>}, {pipeline_mode = #tpu.pipeline_mode<synchronous>, transform_indices = @transform_5, window_bounds = array<i64: 128, 128>}, {pipeline_mode = #tpu.pipeline_mode<synchronous>, transform_indices = @transform_6, window_bounds = array<i64: 1, 128>}, {transform_indices = @transform_7, window_bounds = array<i64: 8, 128>}]} {
    %c0 = arith.constant 0 : index
    %c0_0 = arith.constant 0 : index
    %0 = vector.load %arg1[%c0, %c0_0] : memref<8x128xf32, #tpu.memory_space<vmem>>, vector<8x128xf32>
    %c0_1 = arith.constant 0 : index
    %c0_2 = arith.constant 0 : index
    %1 = vector.load %arg2[%c0_1, %c0_2] : memref<128x128xf32, #tpu.memory_space<vmem>>, vector<128x128xf32>
    %cst = arith.constant dense<0.000000e+00> : vector<8x128xf32>
    %2 = tpu.matmul %0, %1, %cst {dimension_numbers = #tpu.dot_dimension_numbers<[1], [0], [0], [1], [0, 0, 1, 1], [], []>} : vector<8x128xf32>, vector<128x128xf32>, vector<8x128xf32> -> vector<8x128xf32>
    %c0_3 = arith.constant 0 : index
    %c0_4 = arith.constant 0 : index
    %3 = vector.load %arg3[%c0_3, %c0_4] : memref<1x128xf32, #tpu.memory_space<vmem>>, vector<1x128xf32>
    %4 = vector.broadcast %3 : vector<1x128xf32> to vector<8x128xf32>
    %5 = arith.addf %2, %4 : vector<8x128xf32>
    %cst_5 = arith.constant 0.000000e+00 : f32
    %6 = vector.broadcast %cst_5 : f32 to vector<8x128xf32>
    %7 = arith.maximumf %5, %6 : vector<8x128xf32>
    %c0_6 = arith.constant 0 : index
    %c0_7 = arith.constant 0 : index
    %8 = vector.load %arg4[%c0_6, %c0_7] : memref<128x128xf32, #tpu.memory_space<vmem>>, vector<128x128xf32>
    %cst_8 = arith.constant dense<0.000000e+00> : vector<8x128xf32>
    %9 = tpu.matmul %7, %8, %cst_8 {dimension_numbers = #tpu.dot_dimension_numbers<[1], [0], [0], [1], [0, 0, 1, 1], [], []>} : vector<8x128xf32>, vector<128x128xf32>, vector<8x128xf32> -> vector<8x128xf32>
    %c0_9 = arith.constant 0 : index
    %c0_10 = arith.constant 0 : index
    %10 = vector.load %arg5[%c0_9, %c0_10] : memref<1x128xf32, #tpu.memory_space<vmem>>, vector<1x128xf32>
    %11 = vector.broadcast %10 : vector<1x128xf32> to vector<8x128xf32>
    %12 = arith.addf %9, %11 : vector<8x128xf32>
    %cst_11 = arith.constant 0.000000e+00 : f32
    %13 = vector.broadcast %cst_11 : f32 to vector<8x128xf32>
    %14 = arith.maximumf %12, %13 : vector<8x128xf32>
    %c0_12 = arith.constant 0 : index
    %c0_13 = arith.constant 0 : index
    %15 = vector.load %arg6[%c0_12, %c0_13] : memref<128x128xf32, #tpu.memory_space<vmem>>, vector<128x128xf32>
    %cst_14 = arith.constant dense<0.000000e+00> : vector<8x128xf32>
    %16 = tpu.matmul %14, %15, %cst_14 {dimension_numbers = #tpu.dot_dimension_numbers<[1], [0], [0], [1], [0, 0, 1, 1], [], []>} : vector<8x128xf32>, vector<128x128xf32>, vector<8x128xf32> -> vector<8x128xf32>
    %c0_15 = arith.constant 0 : index
    %c0_16 = arith.constant 0 : index
    %17 = vector.load %arg7[%c0_15, %c0_16] : memref<1x128xf32, #tpu.memory_space<vmem>>, vector<1x128xf32>
    %18 = vector.broadcast %17 : vector<1x128xf32> to vector<8x128xf32>
    %19 = arith.addf %16, %18 : vector<8x128xf32>
    %20 = math.tanh %19 : vector<8x128xf32>
    %c0_17 = arith.constant 0 : index
    %c0_18 = arith.constant 0 : index
    %21 = vector.load %arg8[%c0_17, %c0_18] : memref<8x128xf32, #tpu.memory_space<vmem>>, vector<8x128xf32>
    tpu.vector_store %arg8[%c0_17, %c0_18], %20 {strides = array<i32>} : memref<8x128xf32, #tpu.memory_space<vmem>>, vector<8x128xf32>,
    return
  }
  func.func @transform_0(%arg0: i32) -> (i32, i32) {
    %c0_i32 = arith.constant 0 : i32
    %c0_i32_0 = arith.constant 0 : i32
    return %arg0, %c0_i32 : i32, i32
  }
  func.func @transform_1(%arg0: i32) -> (i32, i32) {
    %c0_i32 = arith.constant 0 : i32
    %c0_i32_0 = arith.constant 0 : i32
    %c0_i32_1 = arith.constant 0 : i32
    return %c0_i32, %c0_i32_0 : i32, i32
  }
  func.func @transform_2(%arg0: i32) -> (i32, i32) {
    %c0_i32 = arith.constant 0 : i32
    %c0_i32_0 = arith.constant 0 : i32
    %c0_i32_1 = arith.constant 0 : i32
    return %c0_i32, %c0_i32_0 : i32, i32
  }
  func.func @transform_3(%arg0: i32) -> (i32, i32) {
    %c0_i32 = arith.constant 0 : i32
    %c0_i32_0 = arith.constant 0 : i32
    %c0_i32_1 = arith.constant 0 : i32
    return %c0_i32, %c0_i32_0 : i32, i32
  }
  func.func @transform_4(%arg0: i32) -> (i32, i32) {
    %c0_i32 = arith.constant 0 : i32
    %c0_i32_0 = arith.constant 0 : i32
    %c0_i32_1 = arith.constant 0 : i32
    return %c0_i32, %c0_i32_0 : i32, i32
  }
  func.func @transform_5(%arg0: i32) -> (i32, i32) {
    %c0_i32 = arith.constant 0 : i32
    %c0_i32_0 = arith.constant 0 : i32
    %c0_i32_1 = arith.constant 0 : i32
    return %c0_i32, %c0_i32_0 : i32, i32
  }
  func.func @transform_6(%arg0: i32) -> (i32, i32) {
    %c0_i32 = arith.constant 0 : i32
    %c0_i32_0 = arith.constant 0 : i32
    %c0_i32_1 = arith.constant 0 : i32
    return %c0_i32, %c0_i32_0 : i32, i32
  }
  func.func @transform_7(%arg0: i32) -> (i32, i32) {
    %c0_i32 = arith.constant 0 : i32
    %c0_i32_0 = arith.constant 0 : i32
    return %arg0, %c0_i32 : i32, i32
  }
}

</mosaic_0001>

<bundles_post_ra>
// kernel: tpu_custom_call.1
= control target key start
LH: loop header
LB: loop body
LE: loop exit
PB: predicated region body
PF: predicated region fallthrough
CT: control target
= control target key end

     0   :  { %12 = vsyncpa [#allocation3], 0  ;;  %s443_s0 = inlined_call_operand.hbm [shape: f32[8,128], index: 0, kind: input, shape index: {}]   ;;  %s444_s1 = inlined_call_operand.hbm [shape: f32[128,128], index: 1, kind: input, shape index: {}]   ;;  %s445_s2 = inlined_call_operand.vmem [shape: f32[1,128], index: 2, kind: input, shape index: {}]   ;;  %s446_s3 = inlined_call_operand.hbm [shape: f32[128,128], index: 3, kind: input, shape index: {}]   ;;  %s447_s4 = inlined_call_operand.vmem [shape: f32[1,128], index: 4, kind: input, shape index: {}]   ;;  %s448_s5 = inlined_call_operand.hbm [shape: f32[128,128], index: 5, kind: input, shape index: {}]   ;;  %s449_s6 = inlined_call_operand.vmem [shape: f32[1,128], index: 6, kind: input, shape index: {}]   ;;  %s450_s7 = inlined_call_operand.hbm [shape: f32[8,128], index: 7, kind: output, shape index: {}]  }
   0x1   :  { %13 = vsyncpa [#allocation6], 0 }
   0x2   :  { %14 = vsyncpa [#allocation9], 0  ;;  %s31_s26 = sshll.u32 %s444_s1, 4  ;;  %s32_s26 = int_to_ptr.hbm [resolvable:$true] %s31_s26 }
   0x3   :  { %15 = vsyncpa [#allocation4], 0  ;;  %s372_s27 = smov [#allocation5]   ;;  %s21_s8 = sshll.u32 %s443_s0, 4  ;;  %s22_s8 = int_to_ptr.hbm [resolvable:$true] %s21_s8 }
   0x4   :  { %s33_s28 = sshll.u32 %s372_s27, 4  ;;  %s373_s9 = smov 128   ;;  %s34_s28 = int_to_ptr.vmem [resolvable:$true] %s33_s28 }
   0x5   :  { %s374_s10 = smov 8   ;;  %s375_s11 = smov [#allocation2]  }
   0x6   :  { %39 = dma.hbm_to_vmem [thread:$0]  %s32_s26, 2048, %s34_s28, [#allocation6], %s373_s9, %s373_s9, %s374_s10  }
   0x7   :  { %s23_s12 = sshll.u32 %s375_s11, 4  ;;  %s46_s15 = sshll.u32 %s446_s3, 4  ;;  %s24_s12 = int_to_ptr.vmem [resolvable:$true] %s23_s12  ;;  %s47_s15 = int_to_ptr.hbm [resolvable:$true] %s46_s15 }
   0x8   :  { %26 = dma.hbm_to_vmem [thread:$0]  %s22_s8, 128, %s24_s12, [#allocation3]  }
   0x9   :  { %s61_s17 = sshll.u32 %s448_s5, 4  ;;  %s376_s18 = smov [#allocation7]   ;;  %s62_s17 = int_to_ptr.hbm [resolvable:$true] %s61_s17 }
   0xa   :  { %s48_s19 = sshll.u32 %s376_s18, 4  ;;  %s377_s0 = smov [#allocation8]   ;;  %s49_s19 = int_to_ptr.vmem [resolvable:$true] %s48_s19 }
   0xb   :  { %54 = dma.hbm_to_vmem [thread:$0]  %s47_s15, 2048, %s49_s19, [#allocation6], %s373_s9, %s373_s9, %s374_s10  }
   0xc   :  { %s63_s20 = sshll.u32 %s377_s0, 4  ;;  %s64_s20 = int_to_ptr.vmem [resolvable:$true] %s63_s20 }
   0xd   :  { %69 = dma.hbm_to_vmem [thread:$0]  %s62_s17, 2048, %s64_s20, [#allocation9], %s373_s9, %s373_s9, %s374_s10  }
   0xe   :  { %364 = dma.done.wait [#allocation3], 128  }
   0xf   :  { %365 = vsyncadd [#allocation3], 4294967168 }
  0x10   :  { %366 = dma.done.wait [#allocation6], 4096  }
  0x11   :  { %367 = vsyncadd [#allocation6], 4294963200 }
  0x12   :  { %368 = dma.done.wait [#allocation9], 2048  }
  0x13   :  { %369 = vsyncadd [#allocation9], 4294965248  ;;  %v104_v0 = vld [vmem:[#allocation5 + $0x78] sm:$0xff]  ;;  %v103_v1 = vld [vmem:[#allocation5 + $0x70] sm:$0xff]  ;;  %s378_s24 = smov [#allocation10]   ;;  %s220_s28 = sshll.u32 %s450_s7, 4  ;;  %s221_s28 = int_to_ptr.hbm [resolvable:$true] %s220_s28 }
  0x14   :  { %109 = vmatpush.msra.mxu0 %v104_v0  ;;  %v102_v2 = vld [vmem:[#allocation5 + $0x68] sm:$0xff]  ;;  %v101_v3 = vld [vmem:[#allocation5 + $0x60] sm:$0xff]  ;;  %v145_v4 = vld [vmem:[#allocation7 + $0x78] sm:$0xff]  ;;  %s218_s25 = sshll.u32 %s378_s24, 4  ;;  %s219_s25 = int_to_ptr.vmem [resolvable:$true] %s218_s25 }
  0x15   :  { %v100_v5 = vld [vmem:[#allocation5 + $0x58] sm:$0xff]  ;;  %150 = vmatpush.msra.mxu1 %v145_v4  ;;  %v144_v6 = vld [vmem:[#allocation7 + $0x70] sm:$0xff]  ;;  %v143_v7 = vld [vmem:[#allocation7 + $0x68] sm:$0xff] }
  0x16   :  { %110 = vmatpush.msra.mxu0 %v103_v1  ;;  %v99_v8 = vld [vmem:[#allocation5 + $0x50] sm:$0xff]  ;;  %v142_v9 = vld [vmem:[#allocation7 + $0x60] sm:$0xff]  ;;  %v98_v10 = vld [vmem:[#allocation5 + $0x48] sm:$0xff] }
  0x17   :  { %151 = vmatpush.msra.mxu1 %v144_v6  ;;  %v141_v11 = vld [vmem:[#allocation7 + $0x58] sm:$0xff]  ;;  %v97_v12 = vld [vmem:[#allocation5 + $0x40] sm:$0xff]  ;;  %v140_v13 = vld [vmem:[#allocation7 + $0x50] sm:$0xff] }
  0x18   :  { %111 = vmatpush.msra.mxu0 %v102_v2  ;;  %v96_v14 = vld [vmem:[#allocation5 + $0x38] sm:$0xff]  ;;  %v139_v15 = vld [vmem:[#allocation7 + $0x48] sm:$0xff]  ;;  %v95_v16 = vld [vmem:[#allocation5 + $0x30] sm:$0xff] }
  0x19   :  { %152 = vmatpush.msra.mxu1 %v143_v7  ;;  %v138_v17 = vld [vmem:[#allocation7 + $0x40] sm:$0xff]  ;;  %v94_v18 = vld [vmem:[#allocation5 + $0x28] sm:$0xff]  ;;  %v137_v19 = vld [vmem:[#allocation7 + $0x38] sm:$0xff] }
  0x1a   :  { %112 = vmatpush.msra.mxu0 %v101_v3  ;;  %v93_v20 = vld [vmem:[#allocation5 + $0x20] sm:$0xff]  ;;  %v136_v21 = vld [vmem:[#allocation7 + $0x30] sm:$0xff]  ;;  %v92_v22 = vld [vmem:[#allocation5 + $0x18] sm:$0xff] }
  0x1b   :  { %153 = vmatpush.msra.mxu1 %v142_v9  ;;  %v135_v23 = vld [vmem:[#allocation7 + $0x28] sm:$0xff]  ;;  %v91_v24 = vld [vmem:[#allocation5 + $0x10] sm:$0xff]  ;;  %v134_v25 = vld [vmem:[#allocation7 + $0x20] sm:$0xff] }
  0x1c   :  { %113 = vmatpush.msra.mxu0 %v100_v5  ;;  %v90_v26 = vld [vmem:[#allocation5 + $0x8] sm:$0xff]  ;;  %v133_v27 = vld [vmem:[#allocation7 + $0x18] sm:$0xff]  ;;  %v89_v28 = vld [vmem:[#allocation5] sm:$0xff] }
  0x1d   :  { %154 = vmatpush.msra.mxu1 %v141_v11  ;;  %v88_v29 = vld [vmem:[#allocation2] sm:$0xff]  ;;  %v132_v30 = vld [vmem:[#allocation7 + $0x10] sm:$0xff]  ;;  %v131_v31 = vld [vmem:[#allocation7 + $0x8] sm:$0xff] }
  0x1e   :  { %114 = vmatpush.msra.mxu0 %v99_v8  ;;  %v130_v32 = vld [vmem:[#allocation7] sm:$0xff]  ;;  %v186_v33 = vld [vmem:[#allocation8 + $0x78] sm:$0xff]  ;;  %v185_v34 = vld [vmem:[#allocation8 + $0x70] sm:$0xff] }
  0x1f   :  { %155 = vmatpush.msra.mxu1 %v140_v13  ;;  %191 = vmatpush.msra.mxu2 %v186_v33  ;;  %v184_v35 = vld [vmem:[#allocation8 + $0x68] sm:$0xff]  ;;  %v183_v36 = vld [vmem:[#allocation8 + $0x60] sm:$0xff]  ;;  %v182_v37 = vld [vmem:[#allocation8 + $0x58] sm:$0xff] }
  0x20   :  { %115 = vmatpush.msra.mxu0 %v98_v10  ;;  %v181_v38 = vld [vmem:[#allocation8 + $0x50] sm:$0xff]  ;;  %v180_v39 = vld [vmem:[#allocation8 + $0x48] sm:$0xff]  ;;  %v179_v40 = vld [vmem:[#allocation8 + $0x40] sm:$0xff] }
  0x21   :  { %156 = vmatpush.msra.mxu1 %v139_v15  ;;  %192 = vmatpush.msra.mxu2 %v185_v34  ;;  %v178_v41 = vld [vmem:[#allocation8 + $0x38] sm:$0xff]  ;;  %v177_v42 = vld [vmem:[#allocation8 + $0x30] sm:$0xff]  ;;  %v176_v43 = vld [vmem:[#allocation8 + $0x28] sm:$0xff] }
  0x22   :  { %116 = vmatpush.msra.mxu0 %v97_v12  ;;  %v175_v44 = vld [vmem:[#allocation8 + $0x20] sm:$0xff]  ;;  %v174_v45 = vld [vmem:[#allocation8 + $0x18] sm:$0xff]  ;;  %v173_v50 = vld [vmem:[#allocation8 + $0x10] sm:$0xff] }
  0x23   :  { %157 = vmatpush.msra.mxu1 %v138_v17  ;;  %193 = vmatpush.msra.mxu2 %v184_v35  ;;  %v239_v46 = vld [vmem:[%s445_s2] ss:$0 sm:$0xff]  ;;  %v172_v51 = vld [vmem:[#allocation8 + $0x8] sm:$0xff]  ;;  %v171_v52 = vld [vmem:[#allocation8] sm:$0xff] }
  0x24   :  { %117 = vmatpush.msra.mxu0 %v96_v14  ;;  %v240_v53 = vld [vmem:[%s447_s4] ss:$0 sm:$0xff] }
  0x25   :  { %158 = vmatpush.msra.mxu1 %v137_v19  ;;  %194 = vmatpush.msra.mxu2 %v183_v36  ;;  %v241_v57 = vld [vmem:[%s449_s6] ss:$0 sm:$0xff] }
  0x26   :  { %118 = vmatpush.msra.mxu0 %v95_v16 }
  0x27   :  { %159 = vmatpush.msra.mxu1 %v136_v21  ;;  %195 = vmatpush.msra.mxu2 %v182_v37 }
  0x28   :  { %119 = vmatpush.msra.mxu0 %v94_v18 }
  0x29   :  { %160 = vmatpush.msra.mxu1 %v135_v23  ;;  %196 = vmatpush.msra.mxu2 %v181_v38 }
  0x2a   :  { %120 = vmatpush.msra.mxu0 %v93_v20 }
  0x2b   :  { %161 = vmatpush.msra.mxu1 %v134_v25  ;;  %197 = vmatpush.msra.mxu2 %v180_v39 }
  0x2c   :  { %121 = vmatpush.msra.mxu0 %v92_v22 }
  0x2d   :  { %162 = vmatpush.msra.mxu1 %v133_v27  ;;  %198 = vmatpush.msra.mxu2 %v179_v40 }
  0x2e   :  { %122 = vmatpush.msra.mxu0 %v91_v24 }
  0x2f   :  { %163 = vmatpush.msra.mxu1 %v132_v30  ;;  %199 = vmatpush.msra.mxu2 %v178_v41 }
  0x30   :  { %123 = vmatpush.msra.mxu0 %v90_v26 }
  0x31   :  { %164 = vmatpush.msra.mxu1 %v131_v31  ;;  %200 = vmatpush.msra.mxu2 %v177_v42 }
  0x32   :  { %124 = vmatpush.msra.mxu0 %v89_v28 }
  0x33   :  { %125 = vmatmul.f32.vlgmr.msra.gmra.mxu0 %v88_v29  ;;  %165 = vmatpush.msra.mxu1 %v130_v32 }
  0x34   :  { %201 = vmatpush.msra.mxu2 %v176_v43 }
  0x36   :  { %202 = vmatpush.msra.mxu2 %v175_v44 }
  0x38   :  { %203 = vmatpush.msra.mxu2 %v174_v45 }
  0x3a   :  { %204 = vmatpush.msra.mxu2 %v173_v50 }
  0x3c   :  { %205 = vmatpush.msra.mxu2 %v172_v51 }
  0x3e   :  { %206 = vmatpush.msra.mxu2 %v171_v52 }
  0xb0   :  { %v126_v47 = vpop.f32.mrf.mxu0 }
  0xb1   :  { %v127_v48 = vadd.f32 %v239_v46, %v126_v47 }
  0xb3   :  { %v129_v49 = vmax.f32 %v127_v48, 0.0 }
  0xb5   :  { %166 = vmatmul.f32.vlgmr.msra.gmra.mxu1 %v129_v49 }
 0x132   :  { %v167_v54 = vpop.f32.mrf.mxu1 }
 0x133   :  { %v168_v55 = vadd.f32 %v240_v53, %v167_v54 }
 0x135   :  { %v170_v56 = vmax.f32 %v168_v55, 0.0 }
 0x137   :  { %207 = vmatmul.f32.vlgmr.msra.gmra.mxu2 %v170_v56 }
 0x1ba   :  { %v208_v58 = vpop.f32.mrf.mxu2 }
 0x1bb   :  { %v209_v59 = vadd.f32 %v241_v57, %v208_v58 }
 0x1bd   :  { %242 = vtanh.f32 %v209_v59 }
 0x1c3   :  { %v243_v60 = vpop.eup %242 }
 0x1c4   :  { %212 = vst [vmem:[#allocation10] sm:$0xff] %v243_v60 }
 0x1c5   :  { %223 = dma.vmem_to_hbm [thread:$0]  %s219_s25, 128, %s221_s28, [#allocation4]  }
 0x1c6   :  { %370 = dma.done.wait [#allocation4], 128  }
 0x1c7   :  { %371 = vsyncadd [#allocation4], 4294967168 }
 0x1c8   :  { %228 = vsyncpa [#allocation3], 1 }
 0x1c9   :  { %229 = vsyncpa [#allocation6], 1 }
 0x1ca   :  { %230 = vsyncpa [#allocation9], 1 }
 0x1cb   :  { %231 = vsyncpa [#allocation4], 1 }

</bundles_post_ra>
